<compile_context>
chip_gen: v6e
topology: v6e:2x2x1
jax: 0.10.0
libtpu: 0.0.40
codegen_flags: <defaults>
</compile_context>

<pallas_src>
import functools

import jax
import jax.numpy as jnp
from jax.experimental import pallas as pl
from jax.experimental.pallas import tpu as pltpu


_SMALL_K_MAX = 8  # at or below this channel count the contraction runs on the VPU


def _silu(v):
    return v / (1.0 + jnp.exp(-v))


def _pointwise_conv_kernel(x_ref, w_ref, b_ref, o_ref, *, nonlin, small_k):
    """y = W @ x + b (channel matmul over one plane), optional SiLU."""
    x = x_ref[...]                  # (C_in, S)   S = H*W on the lane axis
    w = w_ref[...]                  # (C_out, C_in)
    b = b_ref[...]                  # (C_out, 1)

    if small_k:
        # A K<=8 contraction would leave the MXU ~empty (K/256 of the array
        # used); do it as an unrolled broadcast-FMA chain on the VPU instead.
        y = w[:, 0:1] * x[0:1, :]
        for c in range(1, x.shape[0]):
            y = y + w[:, c:c + 1] * x[c:c + 1, :]
        y = y + b
    else:
        y = jnp.dot(w, x, preferred_element_type=jnp.float32) + b

    if nonlin:
        y = _silu(y)                # SiLU

    o_ref[...] = y.astype(o_ref.dtype)


def _pointwise_conv(x, w, b, *, nonlin):
    """x: (P, C_in, S), w: (C_out, C_in), b: (C_out,) -> (P, C_out, S)."""
    P, c_in, S = x.shape
    c_out = w.shape[0]
    kernel = functools.partial(
        _pointwise_conv_kernel, nonlin=nonlin, small_k=c_in <= _SMALL_K_MAX)
    return pl.pallas_call(
        kernel,
        out_shape=jax.ShapeDtypeStruct((P, c_out, S), x.dtype),
        grid=(P,),
        in_specs=[
            pl.BlockSpec((None, c_in, S), lambda i: (i, 0, 0)),   # one plane
            pl.BlockSpec((c_out, c_in), lambda i: (0, 0)),        # weight (full)
            pl.BlockSpec((c_out, 1), lambda i: (0, 0)),           # bias (full)
        ],
        out_specs=pl.BlockSpec((None, c_out, S), lambda i: (i, 0, 0)),
        compiler_params=pltpu.CompilerParams(
            dimension_semantics=("parallel",)),   # planes split across TCs on v7x
    )(x, w, b.reshape(c_out, 1))


def upsample_space(x, w, b, *, nonlin=False):
    """Conv2d(dim, 4*dim, 1) [+SiLU] + 'b (c p1 p2) h w -> b c (h p1) (w p2)'.

    x: (B, C, H, W), w: (4C, C), b: (4C,)  ->  (B, C, 2H, 2W)
    """
    B, C, H, W = x.shape
    y = _pointwise_conv(x.reshape(B, C, H * W), w, b, nonlin=nonlin)  # (B,4C,HW)
    # TODO(synk): the (w p2) interleave is a lane-granularity scatter; it is
    # left to XLA as a single fused reshape+transpose over the kernel output.
    y = y.reshape(B, C, 2, 2, H, W)
    y = jnp.transpose(y, (0, 1, 4, 2, 5, 3))      # (B, C, H, 2, W, 2)
    return y.reshape(B, C, 2 * H, 2 * W)


def upsample_time(x, w, b, *, nonlin=False):
    """Conv3d(dim, 2*dim, 1) [+SiLU] + 'b (c p) f h w -> b c (f p) h w'.

    x: (B, C, F, H, W), w: (2C, C), b: (2C,)  ->  (B, C, 2F, H, W)
    """
    B, C, F, H, W = x.shape
    S = H * W
    x2 = jnp.transpose(x.reshape(B, C, F, S), (0, 2, 1, 3)).reshape(B * F, C, S)
    y = _pointwise_conv(x2, w, b, nonlin=nonlin)                      # (B*F,2C,S)
    y = y.reshape(B, F, C, 2, H, W)
    y = jnp.transpose(y, (0, 2, 1, 3, 4, 5))      # (B, C, F, 2, H, W)
    return y.reshape(B, C, 2 * F, H, W)


def upsample_forward(x, space_params=None, time_params=None, *,
                     enable_time=True, nonlin=False):
    """Forward pass of Upsample; space_params/time_params are (weight, bias) or None."""
    assert space_params is not None or time_params is not None
    is_video = x.ndim == 5
    if is_video:
        B, C, F, H, W = x.shape
        # 'b c f h w -> b f c h w' + pack '* c h w'
        x = jnp.transpose(x, (0, 2, 1, 3, 4)).reshape(B * F, C, H, W)
    if space_params is not None:
        x = upsample_space(x, *space_params, nonlin=nonlin)
    if is_video:
        _, C2, H2, W2 = x.shape
        x = jnp.transpose(x.reshape(B, F, C2, H2, W2), (0, 2, 1, 3, 4))
    if (not is_video) or (time_params is None) or (not enable_time):
        return x
    return upsample_time(x, *time_params, nonlin=nonlin)


# ---------------------------------------------------------------------------
# Pure-JAX reference (independent shuffle implementation) for correctness.
# ---------------------------------------------------------------------------
def _upsample_ref(x, space_params=None, time_params=None, *,
                  enable_time=True, nonlin=False):
    act = _silu if nonlin else (lambda v: v)
    is_video = x.ndim == 5
    if is_video:
        B, C, F, H, W = x.shape
        x = jnp.transpose(x, (0, 2, 1, 3, 4)).reshape(B * F, C, H, W)
    if space_params is not None:
        w, b = space_params
        y = act(jnp.einsum('oc,pchw->pohw', w, x) + b[None, :, None, None])
        P, O, Hh, Ww = y.shape
        c2 = O // 4
        out = jnp.zeros((P, c2, 2 * Hh, 2 * Ww), y.dtype)
        for p1 in range(2):
            for p2 in range(2):
                out = out.at[:, :, p1::2, p2::2].set(y[:, 2 * p1 + p2::4])
        x = out
    if is_video:
        _, C2, H2, W2 = x.shape
        x = jnp.transpose(x.reshape(B, F, C2, H2, W2), (0, 2, 1, 3, 4))
    if (not is_video) or (time_params is None) or (not enable_time):
        return x
    w, b = time_params
    y = act(jnp.einsum('oc,bcfhw->bofhw', w, x) + b[None, :, None, None, None])
    Bv, O, Fv, H2, W2 = y.shape
    c2 = O // 2
    out = jnp.zeros((Bv, c2, 2 * Fv, H2, W2), y.dtype)
    for p in range(2):
        out = out.at[:, :, p::2].set(y[:, p::2])
    return out


if __name__ == "__main__":
    key = jax.random.PRNGKey(0)
    keys = jax.random.split(key, 9)

    # 1) default module config: upsample_space only, nonlin=False, image input.
    #    Random (non-repeated) weights keep the check discriminative; the
    #    module's kaiming+repeat init only changes values, not semantics.
    dim, B, H, W = 4, 2, 16, 16
    x_img = jax.random.normal(keys[0], (B, dim, H, W), jnp.float32)
    ws = 0.2 * jax.random.normal(keys[1], (4 * dim, dim), jnp.float32)
    bs = 0.1 * jax.random.normal(keys[2], (4 * dim,), jnp.float32)
    out = jax.block_until_ready(upsample_forward(x_img, space_params=(ws, bs)))
    assert out.shape == (B, dim, 2 * H, 2 * W), out.shape
    ref = _upsample_ref(x_img, space_params=(ws, bs))
    assert jnp.allclose(out, ref, atol=1e-5, rtol=1e-5), "space (image) mismatch"

    # 2) video input, upsample_space + upsample_time, nonlin=True
    F = 4
    x_vid = jax.random.normal(keys[3], (B, dim, F, H, W), jnp.float32)
    wt = 0.2 * jax.random.normal(keys[4], (2 * dim, dim), jnp.float32)
    bt = 0.1 * jax.random.normal(keys[5], (2 * dim,), jnp.float32)
    out = jax.block_until_ready(
        upsample_forward(x_vid, (ws, bs), (wt, bt), nonlin=True))
    assert out.shape == (B, dim, 2 * F, 2 * H, 2 * W), out.shape
    ref = _upsample_ref(x_vid, (ws, bs), (wt, bt), nonlin=True)
    assert jnp.allclose(out, ref, atol=1e-5, rtol=1e-5), "space+time mismatch"

    #    enable_time=False skips the temporal upsample
    out = jax.block_until_ready(
        upsample_forward(x_vid, (ws, bs), (wt, bt), enable_time=False, nonlin=True))
    assert out.shape == (B, dim, F, 2 * H, 2 * W), out.shape
    ref = _upsample_ref(x_vid, (ws, bs), (wt, bt), enable_time=False, nonlin=True)
    assert jnp.allclose(out, ref, atol=1e-5, rtol=1e-5), "enable_time=False mismatch"

    # 3) larger channel count -> exercises the MXU dot path in the kernel
    dim3 = 32
    x3 = jax.random.normal(keys[6], (2, dim3, 16, 16), jnp.float32)
    w3 = 0.2 * jax.random.normal(keys[7], (4 * dim3, dim3), jnp.float32)
    b3 = 0.1 * jax.random.normal(keys[8], (4 * dim3,), jnp.float32)
    out = jax.block_until_ready(upsample_forward(x3, space_params=(w3, b3)))
    ref = _upsample_ref(x3, space_params=(w3, b3))
    assert jnp.allclose(out, ref, atol=1e-5, rtol=1e-5), "MXU path mismatch"

    print("KERNEL_OK")
</pallas_src>

<mosaic_0001>
module attributes {stable_mosaic.version = 11 : i64} {
  func.func @_pointwise_conv_kernel(%arg0: i32, %arg1: memref<1x4x256xf32, #tpu.memory_space<vmem>>, %arg2: memref<16x4xf32, #tpu.memory_space<vmem>>, %arg3: memref<16x1xf32, #tpu.memory_space<vmem>>, %arg4: memref<1x16x256xf32, #tpu.memory_space<vmem>>) attributes {dimension_semantics = [#tpu.dimension_semantics<parallel>], iteration_bounds = array<i64: 2>, scalar_prefetch = 0 : i64, scratch_operands = 0 : i64, tpu.core_type = #tpu.core_type<tc>, window_params = [{transform_indices = @transform_0, window_bounds = array<i64: 1, 4, 256>}, {pipeline_mode = #tpu.pipeline_mode<synchronous>, transform_indices = @transform_1, window_bounds = array<i64: 16, 4>}, {pipeline_mode = #tpu.pipeline_mode<synchronous>, transform_indices = @transform_2, window_bounds = array<i64: 16, 1>}, {transform_indices = @transform_3, window_bounds = array<i64: 1, 16, 256>}]} {
    %c0 = arith.constant 0 : index
    %c0_0 = arith.constant 0 : index
    %c0_1 = arith.constant 0 : index
    %0 = vector.load %arg1[%c0, %c0_0, %c0_1] : memref<1x4x256xf32, #tpu.memory_space<vmem>>, vector<1x4x256xf32>
    %1 = vector.shape_cast %0 : vector<1x4x256xf32> to vector<4x256xf32>
    %c0_2 = arith.constant 0 : index
    %c0_3 = arith.constant 0 : index
    %2 = vector.load %arg2[%c0_2, %c0_3] : memref<16x4xf32, #tpu.memory_space<vmem>>, vector<16x4xf32>
    %c0_4 = arith.constant 0 : index
    %c0_5 = arith.constant 0 : index
    %3 = vector.load %arg3[%c0_4, %c0_5] : memref<16x1xf32, #tpu.memory_space<vmem>>, vector<16x1xf32>
    %4 = vector.extract_strided_slice %2 {offsets = [0, 0], sizes = [16, 1], strides = [1, 1]} : vector<16x4xf32> to vector<16x1xf32>
    %5 = vector.extract_strided_slice %1 {offsets = [0, 0], sizes = [1, 256], strides = [1, 1]} : vector<4x256xf32> to vector<1x256xf32>
    %6 = vector.broadcast %4 : vector<16x1xf32> to vector<16x256xf32>
    %7 = vector.broadcast %5 : vector<1x256xf32> to vector<16x256xf32>
    %8 = arith.mulf %6, %7 : vector<16x256xf32>
    %9 = vector.extract_strided_slice %2 {offsets = [0, 1], sizes = [16, 1], strides = [1, 1]} : vector<16x4xf32> to vector<16x1xf32>
    %10 = vector.extract_strided_slice %1 {offsets = [1, 0], sizes = [1, 256], strides = [1, 1]} : vector<4x256xf32> to vector<1x256xf32>
    %11 = vector.broadcast %9 : vector<16x1xf32> to vector<16x256xf32>
    %12 = vector.broadcast %10 : vector<1x256xf32> to vector<16x256xf32>
    %13 = arith.mulf %11, %12 : vector<16x256xf32>
    %14 = arith.addf %8, %13 : vector<16x256xf32>
    %15 = vector.extract_strided_slice %2 {offsets = [0, 2], sizes = [16, 1], strides = [1, 1]} : vector<16x4xf32> to vector<16x1xf32>
    %16 = vector.extract_strided_slice %1 {offsets = [2, 0], sizes = [1, 256], strides = [1, 1]} : vector<4x256xf32> to vector<1x256xf32>
    %17 = vector.broadcast %15 : vector<16x1xf32> to vector<16x256xf32>
    %18 = vector.broadcast %16 : vector<1x256xf32> to vector<16x256xf32>
    %19 = arith.mulf %17, %18 : vector<16x256xf32>
    %20 = arith.addf %14, %19 : vector<16x256xf32>
    %21 = vector.extract_strided_slice %2 {offsets = [0, 3], sizes = [16, 1], strides = [1, 1]} : vector<16x4xf32> to vector<16x1xf32>
    %22 = vector.extract_strided_slice %1 {offsets = [3, 0], sizes = [1, 256], strides = [1, 1]} : vector<4x256xf32> to vector<1x256xf32>
    %23 = vector.broadcast %21 : vector<16x1xf32> to vector<16x256xf32>
    %24 = vector.broadcast %22 : vector<1x256xf32> to vector<16x256xf32>
    %25 = arith.mulf %23, %24 : vector<16x256xf32>
    %26 = arith.addf %20, %25 : vector<16x256xf32>
    %27 = vector.broadcast %3 : vector<16x1xf32> to vector<16x256xf32>
    %28 = arith.addf %26, %27 : vector<16x256xf32>
    %c0_6 = arith.constant 0 : index
    %c0_7 = arith.constant 0 : index
    %c0_8 = arith.constant 0 : index
    %29 = vector.load %arg4[%c0_6, %c0_7, %c0_8] : memref<1x16x256xf32, #tpu.memory_space<vmem>>, vector<1x16x256xf32>
    %30 = vector.shape_cast %29 : vector<1x16x256xf32> to vector<16x256xf32>
    %31 = vector.shape_cast %28 : vector<16x256xf32> to vector<1x16x256xf32>
    tpu.vector_store %arg4[%c0_6, %c0_7, %c0_8], %31 {strides = array<i32>} : memref<1x16x256xf32, #tpu.memory_space<vmem>>, vector<1x16x256xf32>,
    return
  }
  func.func @transform_0(%arg0: i32) -> (i32, i32, i32) {
    %c0_i32 = arith.constant 0 : i32
    %c0_i32_0 = arith.constant 0 : i32
    %c0_i32_1 = arith.constant 0 : i32
    return %arg0, %c0_i32, %c0_i32_0 : i32, i32, i32
  }
  func.func @transform_1(%arg0: i32) -> (i32, i32) {
    %c0_i32 = arith.constant 0 : i32
    %c0_i32_0 = arith.constant 0 : i32
    %c0_i32_1 = arith.constant 0 : i32
    return %c0_i32, %c0_i32_0 : i32, i32
  }
  func.func @transform_2(%arg0: i32) -> (i32, i32) {
    %c0_i32 = arith.constant 0 : i32
    %c0_i32_0 = arith.constant 0 : i32
    %c0_i32_1 = arith.constant 0 : i32
    return %c0_i32, %c0_i32_0 : i32, i32
  }
  func.func @transform_3(%arg0: i32) -> (i32, i32, i32) {
    %c0_i32 = arith.constant 0 : i32
    %c0_i32_0 = arith.constant 0 : i32
    %c0_i32_1 = arith.constant 0 : i32
    return %arg0, %c0_i32, %c0_i32_0 : i32, i32, i32
  }
}

</mosaic_0001>

<bundles_post_ra>
// kernel: tpu_custom_call.1
= control target key start
LH: loop header
LB: loop body
LE: loop exit
PB: predicated region body
PF: predicated region fallthrough
CT: control target
= control target key end

     0   :  { %8 = vsyncpa [#allocation3], 0  ;;  %s677_s0 = inlined_call_operand.vmem [shape: f32[2,4,256], index: 0, kind: input, shape index: {}]   ;;  %s678_s1 = inlined_call_operand.vmem [shape: f32[16,4], index: 1, kind: input, shape index: {}]   ;;  %s679_s2 = inlined_call_operand.vmem [shape: f32[16,1], index: 2, kind: input, shape index: {}]   ;;  %s680_s3 = inlined_call_operand.hbm [shape: f32[2,16,256], index: 3, kind: output, shape index: {}]  }
   0x1   :  { %10 = vsyncpa [#allocation3 + $0x1], 0  ;;  %s559_s12 = smov 0   ;;  %s561_s13 = smov 0  }
   0x2   :  { %s563_s14 = smov 0   ;;  %s565_s15 = smov 0  }
   0x3 LB: > { %s580_s16 = sadd.s32 4294967295, %s530_s15   ;;  %s403_s17 = sadd.s32 4294967294, %s530_s15   ;;  %s530_s15 = sphi %s565_s15, %s686_s15   ;;  %s526_s14 = sphi %s563_s14, %s685_s14   ;;  %s522_s13 = sphi %s561_s13, %s684_s13   ;;  %s518_s12 = sphi %s559_s12, %s683_s12  }
   0x4   : > { %s584_s18 = sadd.s32 1, %s530_s15   ;;  %s91_s19 = sadd.s32 1, %s526_s14 }
   0x5   : > { %s88_s20 = ssub.s32 %s530_s15, %s584_s18  ;;  %p101_p0 = scmp.ne.s32.totalorder %s526_s14, %s522_s13 }
   0x6   : > { %p89_p1 = scmp.eq.s32.totalorder %s88_s20, 0  ;;  %p102_p2 = scmp.eq.s32.totalorder %s580_s16, 1 }
   0x7   : > { %p107_p3 = scmp.ne.s32.totalorder %s522_s13, %s518_s12  ;;  %p108_p4 = scmp.eq.s32.totalorder %s403_s17, 1 }
   0x8   : > { %s595_s21 = scalar_select %p89_p1, %s526_s14, %s91_s19  }
   0x9   : > { %p597_p5 = por %p102_p2, %p101_p0  ;;  %p601_p6 = por %p108_p4, %p107_p3 }
   0xa   : > { %p406_p7 = scmp.ge.s32.totalorder %s530_s15, 1  ;;  %p140_p8 = scmp.lt.s32.totalorder %s530_s15, 3 }
   0xc   : > { %p141_p9 = pnand %p406_p7, %p140_p8 }
   0xd   : > { %p164_p10 = scmp.lt.s32.totalorder (!%p141_p9), %s580_s16, 1  ;;  %s161_s10 = sand.u32 (!%p141_p9), 1, %s522_s13  }
   0xe   : > { %144 = sbr.rel (%p141_p9) target bundleno = 184 (0xb8), region = 32  ;;  %s407_s11 = sshll.u32 (!%p141_p9), %s161_s10, 5 }
   0xf   : > { %s163_s17 = scalar_lea.vmem (!%p141_p9), [#allocation2], %s407_s11  ;;  %s416_s20 = sshll.u32 (!%p141_p9), %s580_s16, 9 }
  0x10   : > { %s341_s19 = sshll.u32 (!%p141_p9), %s163_s17, 4  ;;  %s633_s26 = scalar_lea.hbm (!%p141_p9), %s680_s3, %s416_s20  ;;  %s628_s19 = int_to_ptr.vmem [resolvable:$true] %s341_s19 }
  0x11   : > { %s470_s27 = scalar_lea.vmem (!%p141_p9), %s628_s19, 512  ;;  %s536_s28 = smov (!%p141_p9), [#allocation2]  }
  0x12   : > { %p471_p11 = scmp.ne.s32.totalorder (!%p141_p9), %s628_s19, %s470_s27  ;;  %s474_s29 = sshll.u32 (!%p141_p9), %s536_s28, 4  ;;  %s475_s29 = int_to_ptr.vmem [resolvable:$false] %s474_s29 }
  0x13   : > { %v170_v0 = vld [vmem:[%s678_s1] sm:$0xff]  ;;  %v532_v1 = vmov 1   ;;  %v533_v2 = vmov 0   ;;  %v171_v3 = vld [vmem:[%s678_s1 + $0x8] sm:$0xff]  ;;  %v534_v4 = vmov 2   ;;  %v535_v5 = vmov 3   ;;  %p477_p0 = scmp.lt.s32.totalorder %s628_s19, %s475_s29 }
  0x14   : > { %463 = vset.pattern.permute.xlu1 %v532_v1  ;;  %462 = vset.pattern.permute.xlu0 %v533_v2  ;;  %v172_v6 = vld [vmem:[%s679_s2] sm:$0xff]  ;;  %v173_v7 = vld [vmem:[%s679_s2 + $0x8] sm:$0xff]  ;;  %s165_s5 = scalar_select %p164_p10, %s580_s16, 1  ;;  %v185_v8 = vlaneseq }
  0x15   : > { %208 = vperm.xlu1 %463, %v170_v0   ;;  %176 = vperm.xlu0 %462, %v170_v0   ;;  %s637_s16 = scalar_lea.sflag [#allocation3], %s161_s10  ;;  %p472_p12 = pnand %p471_p11, %p597_p5 }
  0x16   : > { %s415_s6 = sshll.u32 %s165_s5, 3  ;;  %v186_v9 = vshrl.u32 %v185_v8, 7  ;;  %s476_s30 = scalar_lea.vmem %s475_s29, 1024 }
  0x17   : > { %s168_s9 = scalar_lea.vmem %s677_s0, %s415_s6  ;;  %p473_p13 = pneg %p472_p12 }
  0x18   : > { %v217_v10 = vsub.s32 1, %v186_v9  ;;  %v221_v11 = vsub.s32 5, %v186_v9  ;;  %v187_v12 = vsub.s32 0, %v186_v9  ;;  %v191_v13 = vsub.s32 4, %v186_v9  ;;  %v169_v14 = vld [vmem:[%s168_s9] sm:$0xff]  ;;  %p478_p1 = scmp.lt.s32.totalorder %s476_s30, %s470_s27 }
  0x19   : > { %212 = vperm.xlu1 %463, %v171_v3   ;;  %181 = vperm.xlu0 %462, %v171_v3   ;;  %v251_v15 = vsub.s32 2, %v186_v9  ;;  %v255_v16 = vsub.s32 6, %v186_v9  ;;  %v285_v25 = vsub.s32 3, %v186_v9  ;;  %v289_v26 = vsub.s32 7, %v186_v9 }
  0x1a   : > { %v218_v19 = vrot.slane %v169_v14, %v217_v10  ;;  %v222_v20 = vrot.slane %v169_v14, %v221_v11  ;;  %v188_v21 = vrot.slane %v169_v14, %v187_v12  ;;  %v192_v22 = vrot.slane %v169_v14, %v191_v13  ;;  %p479_p2 = por %p478_p1, %p477_p0 }
  0x1b   : > { %v252_v23 = vrot.slane %v169_v14, %v251_v15  ;;  %v256_v24 = vrot.slane %v169_v14, %v255_v16  ;;  %v286_v35 = vrot.slane %v169_v14, %v285_v25  ;;  %v290_v36 = vrot.slane %v169_v14, %v289_v26 }
  0x1c   : > { %v228_v29 = vrot.slane %v218_v19, %v217_v10  ;;  %v232_v30 = vrot.slane %v222_v20, %v217_v10  ;;  %v198_v31 = vrot.slane %v188_v21, %v187_v12  ;;  %v202_v32 = vrot.slane %v192_v22, %v187_v12  ;;  %p480_p3 = pnand %p479_p2, %p473_p13 }
  0x1d   : > { %465 = vset.pattern.permute.xlu1 %v534_v4  ;;  %464 = vset.pattern.permute.xlu0 %v534_v4  ;;  %v262_v33 = vrot.slane %v252_v23, %v251_v15  ;;  %v266_v34 = vrot.slane %v256_v24, %v251_v15  ;;  %v296_v45 = vrot.slane %v286_v35, %v285_v25 }
  0x1e   : > { %246 = vperm.xlu1 %465, %v171_v3   ;;  %242 = vperm.xlu0 %464, %v170_v0   ;;  %v300_v46 = vrot.slane %v290_v36, %v285_v25 }
  0x22   : > { %466 = vset.pattern.permute.xlu1 %v535_v5  ;;  %467 = vset.pattern.permute.xlu0 %v535_v5 }
  0x23   : > { %276 = vperm.xlu1 %466, %v170_v0   ;;  %280 = vperm.xlu0 %467, %v171_v3  }
  0x27   : > { %468 = vset.pattern.permute.xlu1 %v533_v2  ;;  %469 = vset.pattern.permute.xlu0 %v533_v2 }
  0x28   : > { %311 = vperm.xlu1 %468, %v172_v6  }
  0x2c   : > { %316 = vperm.xlu1 %468, %v173_v7  }
  0x90   : > { %v209_v17 = vpop.permute.xlu1 %208  ;;  %v177_v18 = vpop.permute.xlu0 %176 }
  0x91   : > { %v233_v37 = vmul.f32 %v228_v29, %v209_v17  ;;  %v234_v38 = vmul.f32 %v232_v30, %v209_v17  ;;  %v203_v39 = vmul.f32 %v198_v31, %v177_v18  ;;  %v204_v40 = vmul.f32 %v202_v32, %v177_v18 }
  0x93   : > { %v237_v47 = vadd.f32 %v233_v37, %v203_v39  ;;  %v238_v48 = vadd.f32 %v234_v38, %v204_v40 }
  0x94   : > { %v213_v27 = vpop.permute.xlu1 %212  ;;  %v182_v28 = vpop.permute.xlu0 %181 }
  0x95   : > { %v235_v49 = vmul.f32 %v228_v29, %v213_v27  ;;  %v236_v50 = vmul.f32 %v232_v30, %v213_v27  ;;  %v205_v51 = vmul.f32 %v198_v31, %v182_v28  ;;  %v206_v52 = vmul.f32 %v202_v32, %v182_v28 }
  0x97   : > { %v239_v63 = vadd.f32 %v235_v49, %v205_v51  ;;  %v240_v0 = vadd.f32 %v236_v50, %v206_v52 }
  0x99   : > { %v247_v41 = vpop.permute.xlu1 %246  ;;  %v243_v42 = vpop.permute.xlu0 %242 }
  0x9a   : > { %v267_v43 = vmul.f32 %v262_v33, %v243_v42  ;;  %v268_v44 = vmul.f32 %v266_v34, %v243_v42  ;;  %v269_v59 = vmul.f32 %v262_v33, %v247_v41  ;;  %v270_v60 = vmul.f32 %v266_v34, %v247_v41 }
  0x9c   : > { %v271_v54 = vadd.f32 %v267_v43, %v237_v47  ;;  %v272_v55 = vadd.f32 %v268_v44, %v238_v48  ;;  %v273_v4 = vadd.f32 %v269_v59, %v239_v63  ;;  %v274_v5 = vadd.f32 %v270_v60, %v240_v0 }
  0x9e   : > { %v277_v53 = vpop.permute.xlu1 %276  ;;  %v281_v58 = vpop.permute.xlu0 %280 }
  0x9f   : > { %v301_v56 = vmul.f32 %v296_v45, %v277_v53  ;;  %v302_v57 = vmul.f32 %v300_v46, %v277_v53  ;;  %v303_v1 = vmul.f32 %v296_v45, %v281_v58  ;;  %v304_v2 = vmul.f32 %v300_v46, %v281_v58 }
  0xa1   : > { %v305_v61 = vadd.f32 %v301_v56, %v271_v54  ;;  %v306_v62 = vadd.f32 %v302_v57, %v272_v55  ;;  %v307_v8 = vadd.f32 %v303_v1, %v273_v4  ;;  %v308_v9 = vadd.f32 %v304_v2, %v274_v5 }
  0xa3   : > { %v312_v3 = vpop.permute.xlu1 %311 }
  0xa4   : > { %v319_v6 = vadd.f32 %v312_v3, %v305_v61  ;;  %v320_v7 = vadd.f32 %v312_v3, %v306_v62 }
  0xa6   : > { %323 = vst [vmem:[%s163_s17] sm:$0xff] %v319_v6  ;;  %324 = vst [vmem:[%s163_s17 + $0x8] sm:$0xff] %v320_v7 }
  0xa7   : > { %v317_v10 = vpop.permute.xlu1 %316 }
  0xa8   : > { %v321_v11 = vadd.f32 %v317_v10, %v307_v8  ;;  %v322_v12 = vadd.f32 %v317_v10, %v308_v9 }
  0xaa   : > { %325 = vst [vmem:[%s163_s17 + $0x10] sm:$0xff] %v321_v11  ;;  %326 = vst [vmem:[%s163_s17 + $0x18] sm:$0xff] %v322_v12 }
  0xab   : > { %483 = shalt.err (!%p480_p3)
}
  0xac   : > { %s484_s4 = scalar_lea.hbm %s633_s26, 512  ;;  %s488_s7 = scalar_lea.hbm %s680_s3, 1024 }
  0xad   : > { %p485_p4 = scmp.ne.s32.totalorder %s633_s26, %s484_s4  ;;  %p489_p9 = scmp.lt.s32.totalorder %s633_s26, %s680_s3 }
  0xae   : > { %p490_p10 = scmp.lt.s32.totalorder %s488_s7, %s484_s4 }
  0xaf   : > { %p486_p7 = pnand %p485_p4, %p597_p5 }
  0xb0   : > { %p491_p11 = por %p490_p10, %p489_p9 }
  0xb1   : > { %p487_p8 = pneg %p486_p7 }
  0xb3   : > { %p492_p12 = pnand %p491_p11, %p487_p8 }
  0xb5   : > { %495 = shalt.err (!%p492_p12)
}
  0xb6   : > { %s537_s10 = smov 256   ;;  %s538_s11 = smov 16  }
  0xb7   : > { %417 = dma.vmem_to_hbm [thread:$0]  (%p597_p5), %s628_s19, 512, %s633_s26, %s637_s16, %s537_s10, %s537_s10, %s538_s11  }
  0xb8 PF: > { %p423_p13 = scmp.ge.s32.totalorder %s530_s15, 2  ;;  %s356_s17 = sand.u32 1, %s518_s12  }
  0xb9   : > { %s357_s20 = scalar_lea.sflag [#allocation3], %s356_s17 }
  0xba   : > { %p420_p0 = pnand %p423_p13, %p601_p6 }
  0xbc   : > { %p421_p1 = pneg %p420_p0 }
  0xbe   : > { %513 = dma.done.wait (%p421_p1), %s357_s20, 512  }
  0xbf   : > { %515 = vsyncadd (%p421_p1), %s357_s20, 4294966784  ;;  %p13_p2 = scmp.ge.s32.totalorder %s584_s18, 4   ;;  %s683_s12 = smov %s522_s13 }
  0xc0   : > { %s684_s13 = smov %s526_s14  ;;  %s685_s14 = smov %s595_s21 }
  0xc1   : > { %s686_s15 = smov %s584_s18  ;;  %15 = sbr.rel (!%p13_p2) target bundleno = 3 (0x3), region = 67 }
  0xc6   :  { %362 = vsyncpa [#allocation3], 1 }
  0xc7   :  { %364 = vsyncpa [#allocation3 + $0x1], 1 }

</bundles_post_ra>
